<compile_context>
chip_gen: v7x
topology: tpu7x:2x2x1
jax: 0.10.0
libtpu: 0.0.40
codegen_flags: <defaults>
</compile_context>

<pallas_src>
import functools

import jax
import jax.numpy as jnp
from jax import lax
from jax.experimental import pallas as pl
from jax.experimental.pallas import tpu as pltpu


def _pick_tile(dim, target):
    """Largest clean tile: `target` if it divides dim, else full extent
    (a full-extent block is always a legal BlockSpec)."""
    return target if dim % target == 0 else dim


# --------------------------- tiled linear kernel ---------------------------

def _linear_kernel(x_ref, w_ref, o_ref, acc_ref):
    # x: (tm, tk)    w: (tn, tk)  (torch Linear layout (d_out, d_in))
    # y = x @ w.T accumulated over the K grid axis in f32.
    @pl.when(pl.program_id(2) == 0)
    def _():
        acc_ref[...] = jnp.zeros(acc_ref.shape, acc_ref.dtype)

    acc_ref[...] += lax.dot_general(
        x_ref[...], w_ref[...], (((1,), (1,)), ((), ())),
        preferred_element_type=jnp.float32)

    @pl.when(pl.program_id(2) == pl.num_programs(2) - 1)
    def _():
        o_ref[...] = acc_ref[...].astype(o_ref.dtype)


def pallas_linear(x2d, w, *, tm_target=256, tn_target=256, tk_target=512):
    """y = x2d @ w.T for a torch-style (d_out, d_in) weight, no bias."""
    m, k = x2d.shape
    n = w.shape[0]
    tm = _pick_tile(m, tm_target)
    tn = _pick_tile(n, tn_target)
    tk = _pick_tile(k, tk_target)
    return pl.pallas_call(
        _linear_kernel,
        out_shape=jax.ShapeDtypeStruct((m, n), x2d.dtype),
        grid=(m // tm, n // tn, k // tk),
        in_specs=[
            pl.BlockSpec((tm, tk), lambda i, j, kk: (i, kk)),
            pl.BlockSpec((tn, tk), lambda i, j, kk: (j, kk)),
        ],
        out_specs=pl.BlockSpec((tm, tn), lambda i, j, kk: (i, j)),
        scratch_shapes=[pltpu.VMEM((tm, tn), jnp.float32)],
        compiler_params=pltpu.CompilerParams(
            dimension_semantics=("parallel", "parallel", "arbitrary")),
    )(x2d, w)


# --------------------- flash-style GQA attention kernel ---------------------

def _gqa_flash_kernel(q_ref, k_ref, v_ref, o_ref, m_scr, l_scr, acc_scr, *,
                      kv_heads, d_k, d_v, block_q, block_k, causal):
    # q_ref: (1, block_q, kvH*dk)  -- 1/sqrt(d_k) and the group sum are already
    #                                 folded into the Q projection weight.
    # k_ref: (1, block_k, kvH*dk)   v_ref: (1, block_k, kvH*dv)
    # o_ref: (1, block_q, kvH*dv)
    # scratch (persist across the kv grid axis):
    #   m_scr/l_scr: (kvH, block_q, 1)   acc_scr: (kvH, block_q, dv)
    qi = pl.program_id(1)
    ki = pl.program_id(2)

    @pl.when(ki == 0)
    def _init():
        m_scr[...] = jnp.full(m_scr.shape, -jnp.inf, m_scr.dtype)
        l_scr[...] = jnp.zeros(l_scr.shape, l_scr.dtype)
        acc_scr[...] = jnp.zeros(acc_scr.shape, acc_scr.dtype)

    def compute():
        q = q_ref[0]          # (block_q, kvH*dk)  native dtype -> MXU, f32 acc
        k = k_ref[0]          # (block_k, kvH*dk)
        v = v_ref[0]          # (block_k, kvH*dv)

        if causal:
            # Matches the torch module exactly: tril(ones(Lq, Lk), diagonal=0),
            # i.e. keep col <= row (no Lk-Lq offset), masked value -1e9.
            row = lax.broadcasted_iota(jnp.int32, (block_q, block_k), 0) \
                + qi * block_q
            col = lax.broadcasted_iota(jnp.int32, (block_q, block_k), 1) \
                + ki * block_k
            masked = col > row

        for h in range(kv_heads):      # small static constant
            s = lax.dot_general(
                q[:, h * d_k:(h + 1) * d_k], k[:, h * d_k:(h + 1) * d_k],
                (((1,), (1,)), ((), ())),
                preferred_element_type=jnp.float32)        # (block_q, block_k)
            if causal:
                s = jnp.where(masked, jnp.float32(-1e9), s)

            m_prev = m_scr[h]                               # (block_q, 1)
            m_new = jnp.maximum(m_prev, jnp.max(s, axis=-1, keepdims=True))
            alpha = jnp.exp(m_prev - m_new)
            p = jnp.exp(s - m_new)
            l_scr[h] = alpha * l_scr[h] + jnp.sum(p, axis=-1, keepdims=True)
            acc_scr[h] = alpha * acc_scr[h] + jnp.dot(
                p.astype(v.dtype), v[:, h * d_v:(h + 1) * d_v],
                preferred_element_type=jnp.float32)
            m_scr[h] = m_new

    if causal:
        # Skip kv tiles that are entirely above the diagonal for this q tile.
        @pl.when(ki * block_k <= qi * block_q + (block_q - 1))
        def _():
            compute()
    else:
        compute()

    @pl.when(ki == pl.num_programs(2) - 1)
    def _finalize():
        parts = [
            acc_scr[h] * pl.reciprocal(l_scr[h], approx=True)
            for h in range(kv_heads)
        ]
        o_ref[0] = jnp.concatenate(parts, axis=-1).astype(o_ref.dtype)


def pallas_gqa_attention(q2, k2, v2, *, kv_heads, d_k, d_v, causal,
                         block_q_target=256, block_k_target=512):
    # q2: (B, Lq, kvH*dk)   k2: (B, Lk, kvH*dk)   v2: (B, Lk, kvH*dv)
    # returns (B, Lq, kvH*dv) lane-dense, ready for the output projection.
    b, lq, _ = q2.shape
    lk = k2.shape[1]
    block_q = _pick_tile(lq, block_q_target)
    block_k = _pick_tile(lk, block_k_target)
    kernel = functools.partial(
        _gqa_flash_kernel, kv_heads=kv_heads, d_k=d_k, d_v=d_v,
        block_q=block_q, block_k=block_k, causal=causal)
    return pl.pallas_call(
        kernel,
        out_shape=jax.ShapeDtypeStruct((b, lq, kv_heads * d_v), q2.dtype),
        grid=(b, lq // block_q, lk // block_k),
        in_specs=[
            pl.BlockSpec((1, block_q, kv_heads * d_k),
                         lambda bi, qi, ki: (bi, qi, 0)),
            pl.BlockSpec((1, block_k, kv_heads * d_k),
                         lambda bi, qi, ki: (bi, ki, 0)),
            pl.BlockSpec((1, block_k, kv_heads * d_v),
                         lambda bi, qi, ki: (bi, ki, 0)),
        ],
        out_specs=pl.BlockSpec((1, block_q, kv_heads * d_v),
                               lambda bi, qi, ki: (bi, qi, 0)),
        scratch_shapes=[
            pltpu.VMEM((kv_heads, block_q, 1), jnp.float32),    # running max
            pltpu.VMEM((kv_heads, block_q, 1), jnp.float32),    # running sum
            pltpu.VMEM((kv_heads, block_q, d_v), jnp.float32),  # running out
        ],
        compiler_params=pltpu.CompilerParams(
            dimension_semantics=("parallel", "parallel", "arbitrary")),
    )(q2, k2, v2)


# --------------------------- module-level wrapper ---------------------------

def group_query_attention_forward(Q, K, V, params, *, q_heads, kv_heads,
                                  d_k, d_v, causal,
                                  block_q_target=256, block_k_target=512):
    """Mirrors GroupQueryAttention.forward (pad_attn_mask=None)."""
    b, lq, d_model = Q.shape
    lk = K.shape[1]
    g = q_heads // kv_heads
    scale = 1.0 / (d_k ** 0.5)

    # Scores only ever use sum_g Q_g (the module sums over the query-group axis
    # before softmax).  With no bias, the group sum and the 1/sqrt(d_k) scale
    # fold into W_q: rows (g*kvH + h)*d_k + t  ->  summed over g.
    wq_eff = (params["W_q"]
              .reshape(g, kv_heads, d_k, d_model)
              .sum(axis=0) * scale).reshape(kv_heads * d_k, d_model)

    q2 = pallas_linear(Q.reshape(b * lq, d_model), wq_eff)
    k2 = pallas_linear(K.reshape(b * lk, d_model), params["W_k"])
    v2 = pallas_linear(V.reshape(b * lk, d_model), params["W_v"])

    q2 = q2.reshape(b, lq, kv_heads * d_k)
    k2 = k2.reshape(b, lk, kv_heads * d_k)
    v2 = v2.reshape(b, lk, kv_heads * d_v)

    attn = pallas_gqa_attention(q2, k2, v2, kv_heads=kv_heads, d_k=d_k,
                                d_v=d_v, causal=causal,
                                block_q_target=block_q_target,
                                block_k_target=block_k_target)
    out = pallas_linear(attn.reshape(b * lq, kv_heads * d_v), params["W_o"])
    return out.reshape(b, lq, d_model)


# ------------------------------ pure-JAX ref ------------------------------

def _ref_forward(Q, K, V, params, *, q_heads, kv_heads, d_k, d_v, causal):
    b, lq, d_model = Q.shape
    lk = K.shape[1]
    g = q_heads // kv_heads
    qp = (Q @ params["W_q"].T).reshape(b, lq, q_heads, d_k).transpose(0, 2, 1, 3)
    kp = (K @ params["W_k"].T).reshape(b, lk, kv_heads, d_k).transpose(0, 2, 1, 3)
    vp = (V @ params["W_v"].T).reshape(b, lk, kv_heads, d_v).transpose(0, 2, 1, 3)
    qg = qp.reshape(b, g, kv_heads, lq, d_k)
    x = jnp.einsum("bghqd,bhkd->bghqk", qg, kp) / (d_k ** 0.5)
    x = x.sum(axis=1)                                        # (B, kvH, Lq, Lk)
    if causal:
        mask = jnp.tril(jnp.ones((lq, lk), bool))            # col <= row
        x = jnp.where(mask[None, None], x, -1e9)
    x = jax.nn.softmax(x, axis=-1)
    r = jnp.einsum("bhqk,bhkd->bhqd", x, vp)
    out = r.transpose(0, 2, 1, 3).reshape(b, lq, kv_heads * d_v)
    return out @ params["W_o"].T


# ---------------------------------- main ----------------------------------

if __name__ == "__main__":
    # Lane-aligned small shapes that still exercise the multi-tile flash path:
    # 2 q-tiles x 2 kv-tiles -> online-softmax carry + causal kv-tile skip.
    q_heads, kv_heads = 8, 2
    d_model, d_k, d_v = 128, 32, 32
    B, L = 2, 256
    causal = True

    key = jax.random.PRNGKey(0)
    kq, kk, kv, kwq, kwk, kwv, kwo = jax.random.split(key, 7)

    Q = jax.random.normal(kq, (B, L, d_model), jnp.float32)
    K = jax.random.normal(kk, (B, L, d_model), jnp.float32)
    V = jax.random.normal(kv, (B, L, d_model), jnp.float32)

    def init_linear(k, d_out, d_in):
        bound = 1.0 / (d_in ** 0.5)
        return jax.random.uniform(k, (d_out, d_in), jnp.float32, -bound, bound)

    params = {
        "W_q": init_linear(kwq, d_k * q_heads, d_model),
        "W_k": init_linear(kwk, d_k * kv_heads, d_model),
        "W_v": init_linear(kwv, d_v * kv_heads, d_model),
        "W_o": init_linear(kwo, d_model, d_v * kv_heads),
    }

    out = group_query_attention_forward(
        Q, K, V, params,
        q_heads=q_heads, kv_heads=kv_heads, d_k=d_k, d_v=d_v, causal=causal,
        block_q_target=128, block_k_target=128)
    out = jax.block_until_ready(out)

    ref = _ref_forward(
        Q, K, V, params,
        q_heads=q_heads, kv_heads=kv_heads, d_k=d_k, d_v=d_v, causal=causal)

    assert out.shape == (B, L, d_model)
    assert jnp.allclose(out, ref, atol=2e-3, rtol=2e-3), (
        float(jnp.max(jnp.abs(out - ref))))

    print("KERNEL_OK")
</pallas_src>

<mosaic_0001>
module attributes {stable_mosaic.version = 11 : i64} {
  func.func @_linear_kernel(%arg0: i32, %arg1: i32, %arg2: i32, %arg3: memref<256x128xf32, #tpu.memory_space<vmem>>, %arg4: memref<64x128xf32, #tpu.memory_space<vmem>>, %arg5: memref<256x64xf32, #tpu.memory_space<vmem>>, %arg6: memref<256x64xf32, #tpu.memory_space<vmem>>) attributes {dimension_semantics = [#tpu.dimension_semantics<parallel>, #tpu.dimension_semantics<parallel>, #tpu.dimension_semantics<arbitrary>], iteration_bounds = array<i64: 2, 1, 1>, scalar_prefetch = 0 : i64, scratch_operands = 1 : i64, tpu.core_type = #tpu.core_type<tc>, window_params = [{transform_indices = @transform_0, window_bounds = array<i64: 256, 128>}, {transform_indices = @transform_1, window_bounds = array<i64: 64, 128>}, {transform_indices = @transform_2, window_bounds = array<i64: 256, 64>}]} {
    %c0_i32 = arith.constant 0 : i32
    %0 = arith.cmpi eq, %arg2, %c0_i32 : i32
    %1 = arith.extui %0 : i1 to i32
    %c0_i32_0 = arith.constant 0 : i32
    %2 = arith.cmpi ne, %1, %c0_i32_0 : i32
    scf.if %2 {
      %cst_10 = arith.constant 0.000000e+00 : f32
      %12 = vector.broadcast %cst_10 : f32 to vector<256x64xf32>
      %c0_11 = arith.constant 0 : index
      %c0_12 = arith.constant 0 : index
      %13 = vector.load %arg6[%c0_11, %c0_12] : memref<256x64xf32, #tpu.memory_space<vmem>>, vector<256x64xf32>
      tpu.vector_store %arg6[%c0_11, %c0_12], %12 {strides = array<i32>} : memref<256x64xf32, #tpu.memory_space<vmem>>, vector<256x64xf32>,
    } else {
    }
    %c0 = arith.constant 0 : index
    %c0_1 = arith.constant 0 : index
    %3 = vector.load %arg6[%c0, %c0_1] : memref<256x64xf32, #tpu.memory_space<vmem>>, vector<256x64xf32>
    %c0_2 = arith.constant 0 : index
    %c0_3 = arith.constant 0 : index
    %4 = vector.load %arg3[%c0_2, %c0_3] : memref<256x128xf32, #tpu.memory_space<vmem>>, vector<256x128xf32>
    %c0_4 = arith.constant 0 : index
    %c0_5 = arith.constant 0 : index
    %5 = vector.load %arg4[%c0_4, %c0_5] : memref<64x128xf32, #tpu.memory_space<vmem>>, vector<64x128xf32>
    %cst = arith.constant dense<0.000000e+00> : vector<256x64xf32>
    %6 = tpu.matmul %4, %5, %cst {dimension_numbers = #tpu.dot_dimension_numbers<[1], [1], [0], [0], [0, 0, 1, 0], [], []>} : vector<256x128xf32>, vector<64x128xf32>, vector<256x64xf32> -> vector<256x64xf32>
    %7 = arith.addf %3, %6 : vector<256x64xf32>
    %c0_6 = arith.constant 0 : index
    %c0_7 = arith.constant 0 : index
    %8 = vector.load %arg6[%c0_6, %c0_7] : memref<256x64xf32, #tpu.memory_space<vmem>>, vector<256x64xf32>
    tpu.vector_store %arg6[%c0_6, %c0_7], %7 {strides = array<i32>} : memref<256x64xf32, #tpu.memory_space<vmem>>, vector<256x64xf32>,
    %c0_i32_8 = arith.constant 0 : i32
    %9 = arith.cmpi eq, %arg2, %c0_i32_8 : i32
    %10 = arith.extui %9 : i1 to i32
    %c0_i32_9 = arith.constant 0 : i32
    %11 = arith.cmpi ne, %10, %c0_i32_9 : i32
    scf.if %11 {
      %c0_10 = arith.constant 0 : index
      %c0_11 = arith.constant 0 : index
      %12 = vector.load %arg6[%c0_10, %c0_11] : memref<256x64xf32, #tpu.memory_space<vmem>>, vector<256x64xf32>
      %c0_12 = arith.constant 0 : index
      %c0_13 = arith.constant 0 : index
      %13 = vector.load %arg5[%c0_12, %c0_13] : memref<256x64xf32, #tpu.memory_space<vmem>>, vector<256x64xf32>
      tpu.vector_store %arg5[%c0_12, %c0_13], %12 {strides = array<i32>} : memref<256x64xf32, #tpu.memory_space<vmem>>, vector<256x64xf32>,
    } else {
    }
    return
  }
  func.func @transform_0(%arg0: i32, %arg1: i32, %arg2: i32) -> (i32, i32) {
    %c0_i32 = arith.constant 0 : i32
    return %arg0, %arg2 : i32, i32
  }
  func.func @transform_1(%arg0: i32, %arg1: i32, %arg2: i32) -> (i32, i32) {
    %c0_i32 = arith.constant 0 : i32
    return %arg1, %arg2 : i32, i32
  }
  func.func @transform_2(%arg0: i32, %arg1: i32, %arg2: i32) -> (i32, i32) {
    %c0_i32 = arith.constant 0 : i32
    return %arg0, %arg1 : i32, i32
  }
}

</mosaic_0001>

<bundles_post_ra>
// kernel: tpu_custom_call.1
= control target key start
LH: loop header
LB: loop body
LE: loop exit
PB: predicated region body
PF: predicated region fallthrough
CT: control target
= control target key end

     0   :  { %7 = vsyncpa [#allocation4], 0  ;;  %s1471_s0 = inlined_call_operand.hbm [shape: f32[512,128], index: 0, kind: input, shape index: {}]   ;;  %s1472_s1 = inlined_call_operand.hbm [shape: f32[64,128], index: 1, kind: input, shape index: {}]   ;;  %s1473_s2 = inlined_call_operand.vmem [shape: f32[512,64], index: 2, kind: output, shape index: {}]  }
   0x1   :  { %9 = vsyncpa [#allocation4 + $0x1], 0 }
   0x2   :  { %10 = vsyncpa [#allocation6], 0  ;;  %s1141_s9 = smov 0   ;;  %s1143_s10 = smov 0  }
   0x3   :  { %s1145_s11 = smov 0   ;;  %s1147_s12 = smov 0  }
   0x4   :  { %s1149_s13 = smov 0   ;;  %s1151_s14 = smov 0  }
   0x5 LB: > { %s794_s15 = sadd.s32 4294967295, %s1119_s14   ;;  %p57_p0 = scmp.ne.s32.totalorder %s1103_s10, %s1099_s9  ;;  %s1119_s14 = sphi %s1151_s14, %s16_s14   ;;  %s1115_s13 = sphi %s1149_s13, %s1490_s13   ;;  %s1111_s12 = sphi %s1147_s12, %s1489_s12   ;;  %s1107_s11 = sphi %s1145_s11, %s1488_s11   ;;  %s1103_s10 = sphi %s1143_s10, %s1487_s10   ;;  %s1099_s9 = sphi %s1141_s9, %s1486_s9  }
   0x6   : > { %p1171_p1 = scmp.eq.s32.totalorder %s794_s15, 0  ;;  %p796_p2 = scmp.ge.s32.totalorder %s1119_s14, 1 }
   0x7   : > { %p124_p3 = scmp.lt.s32.totalorder %s1119_s14, 3  ;;  %s1121_s19 = smov [#allocation5]  }
   0x8   : > { %s1478_s16 = scalar_select %p1171_p1, 1, 0 }
   0x9   : > { %p1179_p4 = por %p1171_p1, %p57_p0  ;;  %p1183_p5 = pnand %p796_p2, %p124_p3 }
   0xa   : > { %s140_s20 = sshll.u32 %s1121_s19, 4  ;;  %s35_s22 = sadd.s32 1, %s1115_s13  ;;  %s141_s20 = int_to_ptr.vmem [resolvable:$true] %s140_s20 }
   0xb   : > { %s1479_s17 = scalar_select %p1179_p4, 1, 0 }
   0xc   : > { %s1480_s18 = scalar_select %p1183_p5, 1, 0 }
   0xd   : > { %p944_p6 = pneg %p1183_p5  ;;  %s1007_s25 = scalar_lea.hbm %s1472_s1, 1024 }
   0xe   : > { %p1008_p8 = scmp.ne.s32.totalorder %s1472_s1, %s1007_s25  ;;  %p1014_p12 = scmp.lt.u32.totalorder %s1007_s25, %s1472_s1 }
   0xf   : > { %p1191_p7 = pnand %p944_p6, %p1171_p1 }
  0x11   : > { %p1009_p9 = pneg %p1191_p7 }
  0x13   : > { %p1010_p10 = pnand %p1009_p9, %p1008_p8 }
  0x15   : > { %p1011_p11 = pneg %p1010_p10 }
  0x17   : > { %p1016_p13 = pnand %p1014_p12, %p1011_p11 }
  0x19   : > { %1019 = shalt.err (!%p1016_p13)
}
  0x1a   : > { %s1020_s30 = scalar_lea.vmem %s141_s20, 1024  ;;  %p1028_p6 = scmp.lt.s32.totalorder %s141_s20, %s141_s20 }
  0x1b   : > { %p1021_p0 = scmp.ne.s32.totalorder %s141_s20, %s1020_s30  ;;  %p1029_p1 = scmp.lt.s32.totalorder %s1020_s30, %s1020_s30 }
  0x1d   : > { %p1023_p2 = pnand %p1021_p0, %p1009_p9  ;;  %p1030_p4 = por %p1029_p1, %p1028_p6 }
  0x1f   : > { %p1024_p3 = pneg %p1023_p2 }
  0x21   : > { %p1031_p5 = pnand %p1030_p4, %p1024_p3 }
  0x23   : > { %1034 = shalt.err (!%p1031_p5)
}
  0x24   : > { %s1122_s3 = smov 128   ;;  %s1123_s4 = smov 8  }
  0x25   : > { %947 = dma.hbm_to_vmem [thread:$0]  (!%p1191_p7), %s1472_s1, 1024, %s141_s20, [#allocation6], %s1122_s3, %s1122_s3, %s1123_s4  }
  0x26   : > { %p37_p1 = scmp.ge.s32.totalorder %s35_s22, 2  ;;  %s44_s7 = sadd.s32 1, %s1107_s11 }
  0x27   : > { %p51_p4 = scmp.ne.s32.totalorder %s1107_s11, %s1103_s10  ;;  %p52_p5 = scmp.eq.s32.totalorder %s1119_s14, 0 }
  0x28   : > { %s1492_s22 = smov (%p37_p1, %s35_s22), 0  ;;  %p953_p9 = scmp.lt.s32.totalorder %s1119_s14, 2 }
  0x29   : > { %p53_p8 = por %p52_p5, %p51_p4  ;;  %s39_s8 = ssub.s32 %s1115_s13, %s1492_s22 }
  0x2a   : > { %s154_s9 = sand.u32 1, %s1107_s11   ;;  %p42_p10 = scmp.eq.s32.totalorder %s39_s8, 0 }
  0x2b   : > { %s799_s15 = sshll.u32 %s154_s9, 8  ;;  %s809_s19 = sshll.u32 %s1115_s13, 12 }
  0x2c   : > { %s1227_s21 = scalar_select %p42_p10, %s1107_s11, %s44_s7  }
  0x2d   : > { %s1232_s20 = scalar_lea.hbm %s1471_s0, %s809_s19  ;;  %s158_s25 = scalar_lea.vmem [#allocation3], %s799_s15 }
  0x2e   : > { %s166_s26 = sshll.u32 %s158_s25, 4  ;;  %p1234_p7 = pnand %p953_p9, %p53_p8  ;;  %s1238_s26 = int_to_ptr.vmem [resolvable:$true] %s166_s26 }
  0x2f   : > { %s1240_s28 = scalar_lea.sflag [#allocation4], %s154_s9  ;;  %s1035_s29 = scalar_lea.hbm %s1232_s20, 4096 }
  0x30   : > { %p1036_p11 = scmp.ne.s32.totalorder %s1232_s20, %s1035_s29  ;;  %p1037_p12 = pneg %p1234_p7 }
  0x31   : > { %s1040_s6 = scalar_lea.hbm %s1471_s0, 8192  ;;  %p1041_p2 = scmp.lt.u32.totalorder %s1232_s20, %s1471_s0 }
  0x32   : > { %p1038_p13 = pnand %p1037_p12, %p1036_p11  ;;  %p1042_p3 = scmp.lt.u32.totalorder %s1040_s6, %s1035_s29 }
  0x33   : > { %p1044_p1 = scmp.lt.u32.totalorder %s1035_s29, %s1232_s20 }
  0x34   : > { %p1039_p0 = pneg %p1038_p13  ;;  %p1043_p6 = por %p1042_p3, %p1041_p2 }
  0x36   : > { %p1045_p4 = por %p1044_p1, %p1043_p6 }
  0x38   : > { %p1046_p5 = pnand %p1045_p4, %p1039_p0 }
  0x3a   : > { %1049 = shalt.err (!%p1046_p5)
}
  0x3b   : > { %s1050_s9 = scalar_lea.vmem %s1238_s26, 4096  ;;  %s1124_s15 = smov [#allocation3]  }
  0x3c   : > { %p1051_p8 = scmp.ne.s32.totalorder %s1238_s26, %s1050_s9  ;;  %s1055_s19 = sshll.u32 %s1124_s15, 4  ;;  %s1056_s19 = int_to_ptr.vmem [resolvable:$false] %s1055_s19 }
  0x3d   : > { %s1057_s23 = scalar_lea.vmem %s1056_s19, 8192  ;;  %p1058_p11 = scmp.lt.s32.totalorder %s1238_s26, %s1056_s19 }
  0x3e   : > { %p1053_p9 = pnand %p1051_p8, %p1037_p12  ;;  %p1059_p13 = scmp.lt.s32.totalorder %s1057_s23, %s1050_s9 }
  0x40   : > { %p1054_p10 = pneg %p1053_p9  ;;  %p1060_p2 = por %p1059_p13, %p1058_p11 }
  0x42   : > { %p1061_p3 = pnand %p1060_p2, %p1054_p10 }
  0x44   : > { %1064 = shalt.err (!%p1061_p3)
}
  0x45   : > { %951 = dma.hbm_to_vmem [thread:$0]  (!%p1234_p7), %s1232_s20, 4096, %s1238_s26, %s1240_s28, %s1122_s3, %s1122_s3, %s1123_s4  }
  0x46   : > { %p1483_p12 = scmp.ne.s32.totalorder %s1480_s18, 0 }
  0x47   : > { %s180_s24 = sand.u32 (!%p1483_p12), 1, %s1103_s10   ;;  %p1484_p0 = scmp.ne.s32.totalorder (!%p1483_p12), %s1479_s17, 0 }
  0x48   : > { %178 = sbr.rel (%p1483_p12) target bundleno = 373 (0x175), region = 28  ;;  %s803_s25 = sshll.u32 (!%p1483_p12), %s180_s24, 8 }
  0x49   : > { %s181_s29 = scalar_lea.sflag (!%p1483_p12), [#allocation4], %s180_s24  ;;  %s1274_s30 = scalar_lea.vmem (!%p1483_p12), [#allocation3], %s803_s25 }
  0x4f   : > { %1090 = dma.done.wait (%p1484_p0), %s181_s29, 4096  }
  0x50   : > { %1092 = vsyncadd (%p1484_p0), %s181_s29, 4294963200  ;;  %p1485_p6 = scmp.ne.s32.totalorder %s1478_s16, 0 }
  0x52   : > { %1094 = dma.done.wait (%p1485_p6), [#allocation6], 1024  }
  0x53   : > { %1096 = vsyncadd (%p1485_p6), [#allocation6], 4294966272  ;;  %vm227_vm0 = vcmask 523264   ;;  %v1125_v0 = vmov 0.0   ;;  %v324_v1 = vld [vmem:[#allocation5] sm:$0xff]  ;;  %v325_v2 = vld [vmem:[#allocation5 + $0x8] sm:$0xff] }
  0x54   : > { %229 = vst.msk [vmem:[#allocation2 + $0x8] sm:$0xff] %vm227_vm0, %v1125_v0  ;;  %228 = vst.msk [vmem:[#allocation2] sm:$0xff] %vm227_vm0, %v1125_v0  ;;  %v326_v3 = vld [vmem:[#allocation5 + $0x10] sm:$0xff]  ;;  %v914_v4 = vpack.c.bf16 %v325_v2, %v324_v1  ;;  %v327_v5 = vld [vmem:[#allocation5 + $0x18] sm:$0xff]  ;;  %s805_s16 = sshll.u32 %s1111_s12, 5 }
  0x55   : > { %230 = vst.msk [vmem:[#allocation2 + $0x10] sm:$0xff] %vm227_vm0, %v1125_v0  ;;  %231 = vst.msk [vmem:[#allocation2 + $0x18] sm:$0xff] %vm227_vm0, %v1125_v0  ;;  %v918_v6 = vpack.c.bf16 %v327_v5, %v326_v3  ;;  %v292_v7 = vld [vmem:[%s1274_s30] sm:$0xff]  ;;  %v329_v10 = vld [vmem:[#allocation5 + $0x28] sm:$0xff]  ;;  %p215_p7 = scmp.lt.s32.totalorder %s805_s16, 63 }
  0x56   : > { %232 = vst.msk [vmem:[#allocation2 + $0x20] sm:$0xff] %vm227_vm0, %v1125_v0  ;;  %233 = vst.msk [vmem:[#allocation2 + $0x28] sm:$0xff] %vm227_vm0, %v1125_v0  ;;  %915 = vmatprep.subr.bf16.mxu0 %v914_v4  ;;  %930 = vmatprep.subr.bf16.mxu1 %v914_v4  ;;  %v308_v8 = vld [vmem:[%s1274_s30 + $0x80] sm:$0xff]  ;;  %v330_v12 = vld [vmem:[#allocation5 + $0x30] sm:$0xff] }
  0x57   : > { %234 = vst.msk [vmem:[#allocation2 + $0x30] sm:$0xff] %vm227_vm0, %v1125_v0  ;;  %235 = vst.msk [vmem:[#allocation2 + $0x38] sm:$0xff] %vm227_vm0, %v1125_v0  ;;  %917 = vmatpush3.bf16.xpose.msra.mxu0 %v914_v4  ;;  %934 = vmatpush3.bf16.xpose.msra.mxu1 %v914_v4  ;;  %v328_v9 = vld [vmem:[#allocation5 + $0x20] sm:$0xff]  ;;  %v331_v13 = vld [vmem:[#allocation5 + $0x38] sm:$0xff]  ;;  %s1494_s16 = smov (!%p215_p7, %s805_s16), 63 }
  0x58   : > { %236 = vst.msk [vmem:[#allocation2 + $0x40] sm:$0xff] %vm227_vm0, %v1125_v0  ;;  %237 = vst.msk [vmem:[#allocation2 + $0x48] sm:$0xff] %vm227_vm0, %v1125_v0  ;;  %919 = vmatprep.subr.bf16.mxu0 %v918_v6  ;;  %931 = vmatprep.subr.bf16.mxu1 %v918_v6  ;;  %v922_v11 = vpack.c.bf16 %v329_v10, %v328_v9  ;;  %v926_v14 = vpack.c.bf16 %v331_v13, %v330_v12  ;;  %v293_v15 = vld [vmem:[%s1274_s30 + $0x8] sm:$0xff]  ;;  %v294_v17 = vld [vmem:[%s1274_s30 + $0x10] sm:$0xff]  ;;  %s806_s12 = sshll.u32 %s1494_s16, 3 }
  0x59   : > { %238 = vst.msk [vmem:[#allocation2 + $0x50] sm:$0xff] %vm227_vm0, %v1125_v0  ;;  %239 = vst.msk [vmem:[#allocation2 + $0x58] sm:$0xff] %vm227_vm0, %v1125_v0  ;;  %866 = vmatprep.mubr.f32.mxu0 %v292_v7  ;;  %890 = vmatprep.mubr.f32.mxu1 %v308_v8  ;;  %v309_v16 = vld [vmem:[%s1274_s30 + $0x88] sm:$0xff]  ;;  %v310_v18 = vld [vmem:[%s1274_s30 + $0x90] sm:$0xff]  ;;  %s1361_s3 = scalar_lea.vmem %s1473_s2, %s806_s12 }
  0x5a   : > { %240 = vst.msk [vmem:[#allocation2 + $0x60] sm:$0xff] %vm227_vm0, %v1125_v0  ;;  %241 = vst.msk [vmem:[#allocation2 + $0x68] sm:$0xff] %vm227_vm0, %v1125_v0  ;;  %v295_v19 = vld [vmem:[%s1274_s30 + $0x18] sm:$0xff]  ;;  %v296_v21 = vld [vmem:[%s1274_s30 + $0x20] sm:$0xff] }
  0x5b   : > { %242 = vst.msk [vmem:[#allocation2 + $0x70] sm:$0xff] %vm227_vm0, %v1125_v0  ;;  %243 = vst.msk [vmem:[#allocation2 + $0x78] sm:$0xff] %vm227_vm0, %v1125_v0  ;;  %v311_v20 = vld [vmem:[%s1274_s30 + $0x98] sm:$0xff]  ;;  %v312_v22 = vld [vmem:[%s1274_s30 + $0xa0] sm:$0xff] }
  0x5c   : > { %244 = vst.msk [vmem:[#allocation2 + $0x80] sm:$0xff] %vm227_vm0, %v1125_v0  ;;  %245 = vst.msk [vmem:[#allocation2 + $0x88] sm:$0xff] %vm227_vm0, %v1125_v0  ;;  %v297_v23 = vld [vmem:[%s1274_s30 + $0x28] sm:$0xff]  ;;  %v298_v25 = vld [vmem:[%s1274_s30 + $0x30] sm:$0xff] }
  0x5d   : > { %246 = vst.msk [vmem:[#allocation2 + $0x90] sm:$0xff] %vm227_vm0, %v1125_v0  ;;  %247 = vst.msk [vmem:[#allocation2 + $0x98] sm:$0xff] %vm227_vm0, %v1125_v0  ;;  %v313_v24 = vld [vmem:[%s1274_s30 + $0xa8] sm:$0xff]  ;;  %v314_v26 = vld [vmem:[%s1274_s30 + $0xb0] sm:$0xff] }
  0x5e   : > { %248 = vst.msk [vmem:[#allocation2 + $0xa0] sm:$0xff] %vm227_vm0, %v1125_v0  ;;  %249 = vst.msk [vmem:[#allocation2 + $0xa8] sm:$0xff] %vm227_vm0, %v1125_v0  ;;  %v299_v27 = vld [vmem:[%s1274_s30 + $0x38] sm:$0xff]  ;;  %v300_v29 = vld [vmem:[%s1274_s30 + $0x40] sm:$0xff] }
  0x5f   : > { %250 = vst.msk [vmem:[#allocation2 + $0xb0] sm:$0xff] %vm227_vm0, %v1125_v0  ;;  %251 = vst.msk [vmem:[#allocation2 + $0xb8] sm:$0xff] %vm227_vm0, %v1125_v0  ;;  %921 = vmatpush3.bf16.xpose.msra.mxu0 %v918_v6  ;;  %935 = vmatpush3.bf16.xpose.msra.mxu1 %v918_v6  ;;  %v315_v28 = vld [vmem:[%s1274_s30 + $0xb8] sm:$0xff]  ;;  %v316_v30 = vld [vmem:[%s1274_s30 + $0xc0] sm:$0xff] }
  0x60   : > { %252 = vst.msk [vmem:[#allocation2 + $0xc0] sm:$0xff] %vm227_vm0, %v1125_v0  ;;  %253 = vst.msk [vmem:[#allocation2 + $0xc8] sm:$0xff] %vm227_vm0, %v1125_v0  ;;  %923 = vmatprep.subr.bf16.mxu0 %v922_v11  ;;  %932 = vmatprep.subr.bf16.mxu1 %v922_v11  ;;  %v301_v31 = vld [vmem:[%s1274_s30 + $0x48] sm:$0xff]  ;;  %v302_v33 = vld [vmem:[%s1274_s30 + $0x50] sm:$0xff] }
  0x61   : > { %254 = vst.msk [vmem:[#allocation2 + $0xd0] sm:$0xff] %vm227_vm0, %v1125_v0  ;;  %255 = vst.msk [vmem:[#allocation2 + $0xd8] sm:$0xff] %vm227_vm0, %v1125_v0  ;;  %v317_v32 = vld [vmem:[%s1274_s30 + $0xc8] sm:$0xff]  ;;  %v318_v34 = vld [vmem:[%s1274_s30 + $0xd0] sm:$0xff] }
  0x62   : > { %256 = vst.msk [vmem:[#allocation2 + $0xe0] sm:$0xff] %vm227_vm0, %v1125_v0  ;;  %257 = vst.msk [vmem:[#allocation2 + $0xe8] sm:$0xff] %vm227_vm0, %v1125_v0  ;;  %v303_v35 = vld [vmem:[%s1274_s30 + $0x58] sm:$0xff]  ;;  %v304_v37 = vld [vmem:[%s1274_s30 + $0x60] sm:$0xff] }
  0x63   : > { %258 = vst.msk [vmem:[#allocation2 + $0xf0] sm:$0xff] %vm227_vm0, %v1125_v0  ;;  %259 = vst.msk [vmem:[#allocation2 + $0xf8] sm:$0xff] %vm227_vm0, %v1125_v0  ;;  %v319_v36 = vld [vmem:[%s1274_s30 + $0xd8] sm:$0xff]  ;;  %v320_v38 = vld [vmem:[%s1274_s30 + $0xe0] sm:$0xff] }
  0x64   : > { %v305_v39 = vld [vmem:[%s1274_s30 + $0x68] sm:$0xff]  ;;  %v306_v41 = vld [vmem:[%s1274_s30 + $0x70] sm:$0xff]  ;;  %v307_v43 = vld [vmem:[%s1274_s30 + $0x78] sm:$0xff] }
  0x65   : > { %v321_v40 = vld [vmem:[%s1274_s30 + $0xe8] sm:$0xff]  ;;  %v322_v42 = vld [vmem:[%s1274_s30 + $0xf0] sm:$0xff]  ;;  %v323_v44 = vld [vmem:[%s1274_s30 + $0xf8] sm:$0xff] }
  0x66   : > { %v261_v45 = vld [vmem:[#allocation2 + $0x8] sm:$0xff]  ;;  %v260_v47 = vld [vmem:[#allocation2] sm:$0xff]  ;;  %v263_v57 = vld [vmem:[#allocation2 + $0x18] sm:$0xff] }
  0x67   : > { %925 = vmatpush3.bf16.xpose.msra.mxu0 %v922_v11  ;;  %936 = vmatpush3.bf16.xpose.msra.mxu1 %v922_v11  ;;  %v277_v46 = vld [vmem:[#allocation2 + $0x88] sm:$0xff]  ;;  %v276_v48 = vld [vmem:[#allocation2 + $0x80] sm:$0xff]  ;;  %v279_v58 = vld [vmem:[#allocation2 + $0x98] sm:$0xff] }
  0x68   : > { %927 = vmatprep.subr.bf16.mxu0 %v926_v14  ;;  %933 = vmatprep.subr.bf16.mxu1 %v926_v14  ;;  %v262_v59 = vld [vmem:[#allocation2 + $0x10] sm:$0xff]  ;;  %v265_v5 = vld [vmem:[#allocation2 + $0x28] sm:$0xff]  ;;  %v264_v7 = vld [vmem:[#allocation2 + $0x20] sm:$0xff] }
  0x69   : > { %v278_v60 = vld [vmem:[#allocation2 + $0x90] sm:$0xff]  ;;  %v281_v6 = vld [vmem:[#allocation2 + $0xa8] sm:$0xff]  ;;  %v280_v8 = vld [vmem:[#allocation2 + $0xa0] sm:$0xff] }
  0x6f   : > { %929 = vmatpush3.bf16.xpose.msra.mxu0 %v926_v14  ;;  %937 = vmatpush3.bf16.xpose.msra.mxu1 %v926_v14 }
  0x76   : > { %867 = vmatmul.mubr.f32.vlgmr.msra.gmra.mrb[0].mxu0 %v293_v15  ;;  %891 = vmatmul.mubr.f32.vlgmr.msra.gmra.mrb[0].mxu1 %v309_v16  ;;  %v267_v15 = vld [vmem:[#allocation2 + $0x38] sm:$0xff] }
  0x77   : > { %869 = vmatprep.mubr.f32.mxu0 %v294_v17  ;;  %893 = vmatprep.mubr.f32.mxu1 %v310_v18  ;;  %v283_v16 = vld [vmem:[#allocation2 + $0xb8] sm:$0xff] }
  0x7a   : > { %870 = vmatmul.mubr.f32.gmra.mrb[2].mxu0 %v295_v19  ;;  %894 = vmatmul.mubr.f32.gmra.mrb[2].mxu1 %v311_v20 }
  0x7b   : > { %872 = vmatprep.mubr.f32.mxu0 %v296_v21  ;;  %896 = vmatprep.mubr.f32.mxu1 %v312_v22  ;;  %v266_v21 = vld [vmem:[#allocation2 + $0x30] sm:$0xff] }
  0x7e   : > { %873 = vmatmul.mubr.f32.gmra.mrb[4].mxu0 %v297_v23  ;;  %897 = vmatmul.mubr.f32.gmra.mrb[4].mxu1 %v313_v24  ;;  %v282_v24 = vld [vmem:[#allocation2 + $0xb0] sm:$0xff] }
  0x7f   : > { %875 = vmatprep.mubr.f32.mxu0 %v298_v25  ;;  %899 = vmatprep.mubr.f32.mxu1 %v314_v26 }
  0x82   : > { %876 = vmatmul.mubr.f32.gmra.mrb[6].mxu0 %v299_v27  ;;  %900 = vmatmul.mubr.f32.gmra.mrb[6].mxu1 %v315_v28 }
  0x83   : > { %878 = vmatprep.mubr.f32.mxu0 %v300_v29  ;;  %902 = vmatprep.mubr.f32.mxu1 %v316_v30 }
  0x86   : > { %879 = vmatmul.mubr.f32.gmra.mrb[8].mxu0 %v301_v31  ;;  %903 = vmatmul.mubr.f32.gmra.mrb[8].mxu1 %v317_v32  ;;  %v269_v31 = vld [vmem:[#allocation2 + $0x48] sm:$0xff] }
  0x87   : > { %881 = vmatprep.mubr.f32.mxu0 %v302_v33  ;;  %905 = vmatprep.mubr.f32.mxu1 %v318_v34  ;;  %v285_v32 = vld [vmem:[#allocation2 + $0xc8] sm:$0xff] }
  0x8a   : > { %882 = vmatmul.mubr.f32.gmra.mrb[10].mxu0 %v303_v35  ;;  %906 = vmatmul.mubr.f32.gmra.mrb[10].mxu1 %v319_v36 }
  0x8b   : > { %884 = vmatprep.mubr.f32.mxu0 %v304_v37  ;;  %908 = vmatprep.mubr.f32.mxu1 %v320_v38  ;;  %v268_v37 = vld [vmem:[#allocation2 + $0x40] sm:$0xff] }
  0x8e   : > { %885 = vmatmul.mubr.f32.gmra.mrb[12].mxu0 %v305_v39  ;;  %909 = vmatmul.mubr.f32.gmra.mrb[12].mxu1 %v321_v40  ;;  %v284_v40 = vld [vmem:[#allocation2 + $0xc0] sm:$0xff] }
  0x8f   : > { %887 = vmatprep.mubr.f32.mxu0 %v306_v41  ;;  %911 = vmatprep.mubr.f32.mxu1 %v322_v42 }
  0x92   : > { %888 = vmatmul.mubr.f32.gmra.mrb[14].mxu0 %v307_v43  ;;  %912 = vmatmul.mubr.f32.gmra.mrb[14].mxu1 %v323_v44 }
 0x149   : > { %v868_v49 = vpop.f32.mrb[0].mxu0  ;;  %v892_v50 = vpop.f32.mrb[0].mxu1 }
 0x14a   : > { %v558_v51 = vadd.f32 %v868_v49, %v261_v45  ;;  %v574_v52 = vadd.f32 %v892_v50, %v277_v46  ;;  %v398_v53 = vpop.f32.mrb[1].mxu0  ;;  %v478_v54 = vpop.f32.mrb[1].mxu1 }
 0x14b   : > { %v557_v55 = vadd.f32 %v398_v53, %v260_v47  ;;  %v573_v56 = vadd.f32 %v478_v54, %v276_v48  ;;  %v271_v47 = vld [vmem:[#allocation2 + $0x58] sm:$0xff]  ;;  %v270_v53 = vld [vmem:[#allocation2 + $0x50] sm:$0xff] }
 0x14c   : > { %591 = vst.msk [vmem:[#allocation2 + $0x8] sm:$0xff] %vm227_vm0, %v558_v51  ;;  %607 = vst.msk [vmem:[#allocation2 + $0x88] sm:$0xff] %vm227_vm0, %v574_v52  ;;  %v287_v48 = vld [vmem:[#allocation2 + $0xd8] sm:$0xff] }
 0x14d   : > { %590 = vst.msk [vmem:[#allocation2] sm:$0xff] %vm227_vm0, %v557_v55  ;;  %606 = vst.msk [vmem:[#allocation2 + $0x80] sm:$0xff] %vm227_vm0, %v573_v56  ;;  %v871_v61 = vpop.f32.mrb[2].mxu0  ;;  %v895_v62 = vpop.f32.mrb[2].mxu1  ;;  %v286_v56 = vld [vmem:[#allocation2 + $0xd0] sm:$0xff] }
 0x14e   : > { %v560_v63 = vadd.f32 %v871_v61, %v263_v57  ;;  %v576_v0 = vadd.f32 %v895_v62, %v279_v58  ;;  %v408_v1 = vpop.f32.mrb[3].mxu0  ;;  %v488_v2 = vpop.f32.mrb[3].mxu1 }
 0x14f   : > { %v559_v3 = vadd.f32 %v408_v1, %v262_v59  ;;  %v575_v4 = vadd.f32 %v488_v2, %v278_v60 }
 0x150   : > { %593 = vst.msk [vmem:[#allocation2 + $0x18] sm:$0xff] %vm227_vm0, %v560_v63  ;;  %609 = vst.msk [vmem:[#allocation2 + $0x98] sm:$0xff] %vm227_vm0, %v576_v0  ;;  %v273_v63 = vld [vmem:[#allocation2 + $0x68] sm:$0xff] }
 0x151   : > { %592 = vst.msk [vmem:[#allocation2 + $0x10] sm:$0xff] %vm227_vm0, %v559_v3  ;;  %608 = vst.msk [vmem:[#allocation2 + $0x90] sm:$0xff] %vm227_vm0, %v575_v4  ;;  %v874_v9 = vpop.f32.mrb[4].mxu0  ;;  %v898_v10 = vpop.f32.mrb[4].mxu1  ;;  %v289_v0 = vld [vmem:[#allocation2 + $0xe8] sm:$0xff] }
 0x152   : > { %v562_v11 = vadd.f32 %v874_v9, %v265_v5  ;;  %v578_v12 = vadd.f32 %v898_v10, %v281_v6  ;;  %v418_v13 = vpop.f32.mrb[5].mxu0  ;;  %v498_v14 = vpop.f32.mrb[5].mxu1  ;;  %v272_v5 = vld [vmem:[#allocation2 + $0x60] sm:$0xff] }
 0x153   : > { %v626_v17 = vld [vmem:[#allocation2 + $0x8] sm:$0xff]  ;;  %v561_v19 = vadd.f32 %v418_v13, %v264_v7  ;;  %v577_v20 = vadd.f32 %v498_v14, %v280_v8  ;;  %v288_v8 = vld [vmem:[#allocation2 + $0xe0] sm:$0xff] }
 0x154   : > { %v642_v18 = vld [vmem:[#allocation2 + $0x88] sm:$0xff]  ;;  %658 = vst.msk [vmem:[%s1361_s3 + $0x8] sm:$0xff] %vm227_vm0, %v626_v17  ;;  %v625_v22 = vld [vmem:[#allocation2] sm:$0xff]  ;;  %595 = vst.msk [vmem:[#allocation2 + $0x28] sm:$0xff] %vm227_vm0, %v562_v11 }
 0x155   : > { %674 = vst.msk [vmem:[%s1361_s3 + $0x88] sm:$0xff] %vm227_vm0, %v642_v18  ;;  %v641_v23 = vld [vmem:[#allocation2 + $0x80] sm:$0xff]  ;;  %611 = vst.msk [vmem:[#allocation2 + $0xa8] sm:$0xff] %vm227_vm0, %v578_v12  ;;  %v877_v25 = vpop.f32.mrb[6].mxu0  ;;  %v901_v26 = vpop.f32.mrb[6].mxu1 }
 0x156   : > { %657 = vst.msk [vmem:[%s1361_s3] sm:$0xff] %vm227_vm0, %v625_v22  ;;  %673 = vst.msk [vmem:[%s1361_s3 + $0x80] sm:$0xff] %vm227_vm0, %v641_v23  ;;  %v564_v27 = vadd.f32 %v877_v25, %v267_v15  ;;  %v580_v28 = vadd.f32 %v901_v26, %v283_v16  ;;  %v428_v29 = vpop.f32.mrb[7].mxu0  ;;  %v508_v30 = vpop.f32.mrb[7].mxu1  ;;  %v275_v15 = vld [vmem:[#allocation2 + $0x78] sm:$0xff] }
 0x157   : > { %594 = vst.msk [vmem:[#allocation2 + $0x20] sm:$0xff] %vm227_vm0, %v561_v19  ;;  %610 = vst.msk [vmem:[#allocation2 + $0xa0] sm:$0xff] %vm227_vm0, %v577_v20  ;;  %v628_v33 = vld [vmem:[#allocation2 + $0x18] sm:$0xff]  ;;  %v563_v35 = vadd.f32 %v428_v29, %v266_v21  ;;  %v579_v36 = vadd.f32 %v508_v30, %v282_v24  ;;  %v274_v21 = vld [vmem:[#allocation2 + $0x70] sm:$0xff] }
 0x158   : > { %v644_v34 = vld [vmem:[#allocation2 + $0x98] sm:$0xff]  ;;  %660 = vst.msk [vmem:[%s1361_s3 + $0x18] sm:$0xff] %vm227_vm0, %v628_v33  ;;  %v627_v38 = vld [vmem:[#allocation2 + $0x10] sm:$0xff]  ;;  %597 = vst.msk [vmem:[#allocation2 + $0x38] sm:$0xff] %vm227_vm0, %v564_v27 }
 0x159   : > { %676 = vst.msk [vmem:[%s1361_s3 + $0x98] sm:$0xff] %vm227_vm0, %v644_v34  ;;  %v643_v39 = vld [vmem:[#allocation2 + $0x90] sm:$0xff]  ;;  %613 = vst.msk [vmem:[#allocation2 + $0xb8] sm:$0xff] %vm227_vm0, %v580_v28  ;;  %v880_v41 = vpop.f32.mrb[8].mxu0  ;;  %v904_v42 = vpop.f32.mrb[8].mxu1  ;;  %v291_v16 = vld [vmem:[#allocation2 + $0xf8] sm:$0xff] }
 0x15a   : > { %659 = vst.msk [vmem:[%s1361_s3 + $0x10] sm:$0xff] %vm227_vm0, %v627_v38  ;;  %675 = vst.msk [vmem:[%s1361_s3 + $0x90] sm:$0xff] %vm227_vm0, %v643_v39  ;;  %v566_v43 = vadd.f32 %v880_v41, %v269_v31  ;;  %v582_v44 = vadd.f32 %v904_v42, %v285_v32  ;;  %v438_v45 = vpop.f32.mrb[9].mxu0  ;;  %v518_v46 = vpop.f32.mrb[9].mxu1  ;;  %v290_v24 = vld [vmem:[#allocation2 + $0xf0] sm:$0xff] }
 0x15b   : > { %596 = vst.msk [vmem:[#allocation2 + $0x30] sm:$0xff] %vm227_vm0, %v563_v35  ;;  %612 = vst.msk [vmem:[#allocation2 + $0xb0] sm:$0xff] %vm227_vm0, %v579_v36  ;;  %v630_v49 = vld [vmem:[#allocation2 + $0x28] sm:$0xff]  ;;  %v565_v51 = vadd.f32 %v438_v45, %v268_v37  ;;  %v581_v52 = vadd.f32 %v518_v46, %v284_v40 }
 0x15c   : > { %v646_v50 = vld [vmem:[#allocation2 + $0xa8] sm:$0xff]  ;;  %662 = vst.msk [vmem:[%s1361_s3 + $0x28] sm:$0xff] %vm227_vm0, %v630_v49  ;;  %599 = vst.msk [vmem:[#allocation2 + $0x48] sm:$0xff] %vm227_vm0, %v566_v43 }
 0x15d   : > { %678 = vst.msk [vmem:[%s1361_s3 + $0xa8] sm:$0xff] %vm227_vm0, %v646_v50  ;;  %615 = vst.msk [vmem:[#allocation2 + $0xc8] sm:$0xff] %vm227_vm0, %v582_v44  ;;  %v883_v57 = vpop.f32.mrb[10].mxu0  ;;  %v907_v58 = vpop.f32.mrb[10].mxu1 }
 0x15e   : > { %v629_v54 = vld [vmem:[#allocation2 + $0x20] sm:$0xff]  ;;  %598 = vst.msk [vmem:[#allocation2 + $0x40] sm:$0xff] %vm227_vm0, %v565_v51  ;;  %614 = vst.msk [vmem:[#allocation2 + $0xc0] sm:$0xff] %vm227_vm0, %v581_v52  ;;  %v568_v59 = vadd.f32 %v883_v57, %v271_v47  ;;  %v584_v60 = vadd.f32 %v907_v58, %v287_v48  ;;  %v448_v61 = vpop.f32.mrb[11].mxu0  ;;  %v528_v62 = vpop.f32.mrb[11].mxu1 }
 0x15f   : > { %v645_v55 = vld [vmem:[#allocation2 + $0xa0] sm:$0xff]  ;;  %661 = vst.msk [vmem:[%s1361_s3 + $0x20] sm:$0xff] %vm227_vm0, %v629_v54  ;;  %v632_v1 = vld [vmem:[#allocation2 + $0x38] sm:$0xff]  ;;  %v567_v3 = vadd.f32 %v448_v61, %v270_v53  ;;  %v583_v4 = vadd.f32 %v528_v62, %v286_v56 }
 0x160   : > { %677 = vst.msk [vmem:[%s1361_s3 + $0xa0] sm:$0xff] %vm227_vm0, %v645_v55  ;;  %v648_v2 = vld [vmem:[#allocation2 + $0xb8] sm:$0xff]  ;;  %664 = vst.msk [vmem:[%s1361_s3 + $0x38] sm:$0xff] %vm227_vm0, %v632_v1 }
 0x161   : > { %680 = vst.msk [vmem:[%s1361_s3 + $0xb8] sm:$0xff] %vm227_vm0, %v648_v2  ;;  %601 = vst.msk [vmem:[#allocation2 + $0x58] sm:$0xff] %vm227_vm0, %v568_v59  ;;  %v886_v9 = vpop.f32.mrb[12].mxu0  ;;  %v910_v10 = vpop.f32.mrb[12].mxu1 }
 0x162   : > { %v631_v6 = vld [vmem:[#allocation2 + $0x30] sm:$0xff]  ;;  %617 = vst.msk [vmem:[#allocation2 + $0xd8] sm:$0xff] %vm227_vm0, %v584_v60  ;;  %600 = vst.msk [vmem:[#allocation2 + $0x50] sm:$0xff] %vm227_vm0, %v567_v3  ;;  %v570_v11 = vadd.f32 %v886_v9, %v273_v63  ;;  %v586_v12 = vadd.f32 %v910_v10, %v289_v0  ;;  %v458_v13 = vpop.f32.mrb[13].mxu0  ;;  %v538_v14 = vpop.f32.mrb[13].mxu1 }
 0x163   : > { %v647_v7 = vld [vmem:[#allocation2 + $0xb0] sm:$0xff]  ;;  %663 = vst.msk [vmem:[%s1361_s3 + $0x30] sm:$0xff] %vm227_vm0, %v631_v6  ;;  %616 = vst.msk [vmem:[#allocation2 + $0xd0] sm:$0xff] %vm227_vm0, %v583_v4  ;;  %v634_v17 = vld [vmem:[#allocation2 + $0x48] sm:$0xff]  ;;  %v569_v19 = vadd.f32 %v458_v13, %v272_v5  ;;  %v585_v20 = vadd.f32 %v538_v14, %v288_v8 }
 0x164   : > { %679 = vst.msk [vmem:[%s1361_s3 + $0xb0] sm:$0xff] %vm227_vm0, %v647_v7  ;;  %v650_v18 = vld [vmem:[#allocation2 + $0xc8] sm:$0xff]  ;;  %666 = vst.msk [vmem:[%s1361_s3 + $0x48] sm:$0xff] %vm227_vm0, %v634_v17 }
 0x165   : > { %682 = vst.msk [vmem:[%s1361_s3 + $0xc8] sm:$0xff] %vm227_vm0, %v650_v18  ;;  %v633_v22 = vld [vmem:[#allocation2 + $0x40] sm:$0xff]  ;;  %603 = vst.msk [vmem:[#allocation2 + $0x68] sm:$0xff] %vm227_vm0, %v570_v11  ;;  %v889_v25 = vpop.f32.mrb[14].mxu0  ;;  %v913_v26 = vpop.f32.mrb[14].mxu1 }
 0x166   : > { %v649_v23 = vld [vmem:[#allocation2 + $0xc0] sm:$0xff]  ;;  %619 = vst.msk [vmem:[#allocation2 + $0xe8] sm:$0xff] %vm227_vm0, %v586_v12  ;;  %665 = vst.msk [vmem:[%s1361_s3 + $0x40] sm:$0xff] %vm227_vm0, %v633_v22  ;;  %v572_v27 = vadd.f32 %v889_v25, %v275_v15  ;;  %v588_v28 = vadd.f32 %v913_v26, %v291_v16  ;;  %v468_v29 = vpop.f32.mrb[15].mxu0  ;;  %v548_v30 = vpop.f32.mrb[15].mxu1 }
 0x167   : > { %681 = vst.msk [vmem:[%s1361_s3 + $0xc0] sm:$0xff] %vm227_vm0, %v649_v23  ;;  %602 = vst.msk [vmem:[#allocation2 + $0x60] sm:$0xff] %vm227_vm0, %v569_v19  ;;  %v571_v33 = vadd.f32 %v468_v29, %v274_v21  ;;  %v587_v34 = vadd.f32 %v548_v30, %v290_v24 }
 0x168   : > { %618 = vst.msk [vmem:[#allocation2 + $0xe0] sm:$0xff] %vm227_vm0, %v585_v20  ;;  %v636_v31 = vld [vmem:[#allocation2 + $0x58] sm:$0xff]  ;;  %605 = vst.msk [vmem:[#allocation2 + $0x78] sm:$0xff] %vm227_vm0, %v572_v27 }
 0x169   : > { %v652_v32 = vld [vmem:[#allocation2 + $0xd8] sm:$0xff]  ;;  %668 = vst.msk [vmem:[%s1361_s3 + $0x58] sm:$0xff] %vm227_vm0, %v636_v31  ;;  %v635_v35 = vld [vmem:[#allocation2 + $0x50] sm:$0xff]  ;;  %621 = vst.msk [vmem:[#allocation2 + $0xf8] sm:$0xff] %vm227_vm0, %v588_v28 }
 0x16a   : > { %684 = vst.msk [vmem:[%s1361_s3 + $0xd8] sm:$0xff] %vm227_vm0, %v652_v32  ;;  %v651_v36 = vld [vmem:[#allocation2 + $0xd0] sm:$0xff]  ;;  %667 = vst.msk [vmem:[%s1361_s3 + $0x50] sm:$0xff] %vm227_vm0, %v635_v35 }
 0x16b   : > { %683 = vst.msk [vmem:[%s1361_s3 + $0xd0] sm:$0xff] %vm227_vm0, %v651_v36  ;;  %604 = vst.msk [vmem:[#allocation2 + $0x70] sm:$0xff] %vm227_vm0, %v571_v33 }
 0x16c   : > { %620 = vst.msk [vmem:[#allocation2 + $0xf0] sm:$0xff] %vm227_vm0, %v587_v34  ;;  %v638_v37 = vld [vmem:[#allocation2 + $0x68] sm:$0xff] }
 0x16d   : > { %v654_v38 = vld [vmem:[#allocation2 + $0xe8] sm:$0xff]  ;;  %670 = vst.msk [vmem:[%s1361_s3 + $0x68] sm:$0xff] %vm227_vm0, %v638_v37 }
 0x16e   : > { %686 = vst.msk [vmem:[%s1361_s3 + $0xe8] sm:$0xff] %vm227_vm0, %v654_v38  ;;  %v637_v39 = vld [vmem:[#allocation2 + $0x60] sm:$0xff] }
 0x16f   : > { %v653_v40 = vld [vmem:[#allocation2 + $0xe0] sm:$0xff]  ;;  %669 = vst.msk [vmem:[%s1361_s3 + $0x60] sm:$0xff] %vm227_vm0, %v637_v39  ;;  %v640_v41 = vld [vmem:[#allocation2 + $0x78] sm:$0xff] }
 0x170   : > { %685 = vst.msk [vmem:[%s1361_s3 + $0xe0] sm:$0xff] %vm227_vm0, %v653_v40  ;;  %v656_v42 = vld [vmem:[#allocation2 + $0xf8] sm:$0xff]  ;;  %672 = vst.msk [vmem:[%s1361_s3 + $0x78] sm:$0xff] %vm227_vm0, %v640_v41 }
 0x171   : > { %688 = vst.msk [vmem:[%s1361_s3 + $0xf8] sm:$0xff] %vm227_vm0, %v656_v42 }
 0x172   : > { %v639_v43 = vld [vmem:[#allocation2 + $0x70] sm:$0xff] }
 0x173   : > { %v655_v44 = vld [vmem:[#allocation2 + $0xf0] sm:$0xff]  ;;  %671 = vst.msk [vmem:[%s1361_s3 + $0x70] sm:$0xff] %vm227_vm0, %v639_v43 }
 0x174   : > { %687 = vst.msk [vmem:[%s1361_s3 + $0xf0] sm:$0xff] %vm227_vm0, %v655_v44 }
 0x175 PF: > { %s16_s14 = sadd.s32 1, %s1119_s14   ;;  %s1486_s9 = smov %s1103_s10 }
 0x176   : > { %p13_p1 = scmp.ge.s32.totalorder %s16_s14, 4   ;;  %s1487_s10 = smov %s1107_s11 }
 0x177   : > { %s1488_s11 = smov %s1227_s21  ;;  %s1489_s12 = smov %s1115_s13 }
 0x178   : > { %s1490_s13 = smov %s1492_s22  ;;  %15 = sbr.rel (!%p13_p1) target bundleno = 5 (0x5), region = 81 }
 0x17f   :  { %717 = vsyncpa [#allocation4], 1 }
 0x180   :  { %719 = vsyncpa [#allocation4 + $0x1], 1 }
 0x181   :  { %720 = vsyncpa [#allocation6], 1 }

</bundles_post_ra>
